<compile_context>
chip_gen: v7x
topology: tpu7x:2x2x1
jax: 0.10.0
libtpu: 0.0.40
codegen_flags: <defaults>
</compile_context>

<pallas_src>
import jax
import jax.numpy as jnp
from jax.experimental import pallas as pl
from jax.experimental.pallas import tpu as pltpu

# ---------------------------------------------------------------------------
# Model dimensions (small, synthetic)
# ---------------------------------------------------------------------------
B = 2          # batch
S = 8          # sequence length
H = 32         # hidden size
F = 64         # FFN intermediate size
VOCAB = 100    # word vocab
NTYPE = 2      # token-type vocab
HP = 128       # one 128-lane block (lane-aligned padding width)
NENC = 2       # question encoder + passage encoder fused into one call
R = B * S      # flattened rows per encoder (CLS rows first)
PSLAB_ROWS = 16  # f32 param-slab sublane rows (multiple of 8, >= 8 + B)
NEG = 1e9      # additive-mask magnitude


def _layer_norm(x, gamma, beta, eps=1e-12):
    mean = jnp.mean(x, axis=-1, keepdims=True)
    var = jnp.mean((x - mean) ** 2, axis=-1, keepdims=True)
    return (x - mean) * jax.lax.rsqrt(var + eps) * gamma + beta


# ---------------------------------------------------------------------------
# Pallas kernel: both encoders, whole batch, one invocation.
# ---------------------------------------------------------------------------
def biencoder_kernel(x_ref, wqkv_ref, ws_ref, ps_ref, out_ref):
    outs = []
    # Static Python loop -> fully unrolled, two independent per-encoder chains.
    for e in range(NENC):
        x = x_ref[e]                         # (R, H) f32, CLS rows first
        ps = ps_ref[e]                       # (PSLAB_ROWS, 3*HP) f32 packed params
        bqkv = ps[0:1, :]                    # (1, 3*HP) lane-aligned q|k|v biases
        bo, b2 = ps[1:2, :H], ps[2:3, :H]
        g1, be1 = ps[3:4, :H], ps[4:5, :H]
        g2, be2 = ps[5:6, :H], ps[6:7, :H]
        b1 = ps[7:8, :F]
        bias = ps[8:8 + B, :R]               # (B, R) additive attention bias

        ws = ws_ref[e]                       # (H+H+F, F) bf16 packed wo|w1|w2
        wo = ws[0:H, 0:H]
        w1 = ws[H:2 * H, 0:F]
        w2 = ws[2 * H:2 * H + F, 0:H]

        # ---- fused QKV projection: single bf16 MXU push, f32 accumulation.
        # q/k/v each start on a 128-lane boundary (zero-padded lanes 32..127).
        qkv = jnp.dot(x.astype(jnp.bfloat16), wqkv_ref[e],
                      preferred_element_type=jnp.float32) + bqkv      # (R, 3*HP)
        q_cls = qkv[0:B, 0:HP]               # only CLS queries are ever read out
        k = qkv[:, HP:2 * HP]                # (R, HP)
        v = qkv[:, 2 * HP:3 * HP]            # (R, HP)

        # ---- 2-D attention over flattened rows.  Batch block-diagonality and
        # key-padding mask are folded into the precomputed additive bias.
        # (zero-padded lanes contribute 0 to the contraction)
        scores = jax.lax.dot_general(
            q_cls.astype(jnp.bfloat16), k.astype(jnp.bfloat16),
            dimension_numbers=(((1,), (1,)), ((), ())),
            preferred_element_type=jnp.float32) * (float(H) ** -0.5)  # (B, R)
        scores = scores + bias
        scores = scores - jnp.max(scores, axis=-1, keepdims=True)
        p = jnp.exp(scores)
        p = p * pl.reciprocal(jnp.sum(p, axis=-1, keepdims=True), approx=True)

        attn = jnp.dot(p.astype(jnp.bfloat16), v.astype(jnp.bfloat16),
                       preferred_element_type=jnp.float32)[:, 0:H]    # (B, H)
        attn = jnp.dot(attn.astype(jnp.bfloat16), wo,
                       preferred_element_type=jnp.float32) + bo
        hid = _layer_norm(x[0:B, :] + attn, g1, be1)                  # (B, H)

        # ---- feed-forward (CLS rows only) ----
        ff = jnp.dot(hid.astype(jnp.bfloat16), w1,
                     preferred_element_type=jnp.float32) + b1
        ff = jax.nn.gelu(ff, approximate=True)   # TODO(synk): HF BERT uses erf GELU
        ff = jnp.dot(ff.astype(jnp.bfloat16), w2,
                     preferred_element_type=jnp.float32) + b2
        outs.append(_layer_norm(hid + ff, g2, be2))                   # (B, H)

    # Single lane-dense store: (NENC*B, 128) slab, real data in lanes 0:H.
    res = jnp.concatenate(outs, axis=0)                               # (NENC*B, H)
    pad = jnp.zeros((NENC * B, HP - H), jnp.float32)
    out_ref[...] = jnp.concatenate([res, pad], axis=-1).astype(out_ref.dtype)


# ---------------------------------------------------------------------------
# pallas_call wrapper: no grid, whole arrays resident in VMEM, 4 operands.
# ---------------------------------------------------------------------------
def fused_biencoder(x, wqkv, wslab, pslab):
    vmem = pl.BlockSpec(memory_space=pltpu.MemorySpace.VMEM)
    out = pl.pallas_call(
        biencoder_kernel,
        out_shape=jax.ShapeDtypeStruct((NENC * B, HP), jnp.float32),
        in_specs=[vmem, vmem, vmem, vmem],
        out_specs=vmem,
    )(x, wqkv, wslab, pslab)
    return out[:, :H].reshape(NENC, B, H)     # strip lane padding -> (2, B, H)


# ---------------------------------------------------------------------------
# Parameter init + wrapper-side packing (all glue; hot path is in the kernel)
# ---------------------------------------------------------------------------
def init_encoder_params(key):
    ks = jax.random.split(key, 10)
    scale = 0.02
    return {
        "word_emb": scale * jax.random.normal(ks[0], (VOCAB, H), jnp.float32),
        "type_emb": scale * jax.random.normal(ks[1], (NTYPE, H), jnp.float32),
        "pos_emb":  scale * jax.random.normal(ks[2], (S, H), jnp.float32),
        "wq": scale * jax.random.normal(ks[3], (H, H), jnp.float32),
        "bq": jnp.zeros((1, H), jnp.float32),
        "wk": scale * jax.random.normal(ks[4], (H, H), jnp.float32),
        "bk": jnp.zeros((1, H), jnp.float32),
        "wv": scale * jax.random.normal(ks[5], (H, H), jnp.float32),
        "bv": jnp.zeros((1, H), jnp.float32),
        "wo": scale * jax.random.normal(ks[6], (H, H), jnp.float32),
        "bo": jnp.zeros((1, H), jnp.float32),
        "g1": jnp.ones((1, H), jnp.float32),
        "be1": jnp.zeros((1, H), jnp.float32),
        "w1": scale * jax.random.normal(ks[7], (H, F), jnp.float32),
        "b1": jnp.zeros((1, F), jnp.float32),
        "w2": scale * jax.random.normal(ks[8], (F, H), jnp.float32),
        "b2": jnp.zeros((1, H), jnp.float32),
        "g2": jnp.ones((1, H), jnp.float32),
        "be2": jnp.zeros((1, H), jnp.float32),
    }


def _pad_lanes(a, width):
    return jnp.pad(a, ((0, 0), (0, width - a.shape[-1])))


def _flatten_cls_first(x_bsh):
    """(B, S, H) -> (B*S, H) with all CLS tokens first (rows 0..B-1)."""
    cls = x_bsh[:, 0, :]
    rest = x_bsh[:, 1:, :].reshape(B * (S - 1), H)
    return jnp.concatenate([cls, rest], axis=0)


def _build_attn_bias(mask_bs):
    """Additive bias (B, B*S): 0 for valid same-batch keys, -1e9 otherwise.

    Row order of keys matches _flatten_cls_first: first B CLS tokens, then
    batch-major remaining tokens.
    """
    key_batch = jnp.concatenate(
        [jnp.arange(B, dtype=jnp.int32),
         jnp.repeat(jnp.arange(B, dtype=jnp.int32), S - 1)])
    key_pos = jnp.concatenate(
        [jnp.zeros((B,), jnp.int32),
         jnp.tile(jnp.arange(1, S, dtype=jnp.int32), B)])
    valid = mask_bs[key_batch, key_pos].astype(jnp.float32)            # (B*S,)
    same = (key_batch[None, :] ==
            jnp.arange(B, dtype=jnp.int32)[:, None]).astype(jnp.float32)
    # NOTE: CLS keys are assumed valid, so every query row has >= 1 unmasked key.
    return (same * valid[None, :] - 1.0) * NEG                         # (B, B*S)


def pack_params(q_params, p_params, q_mask, p_mask):
    """Pack each encoder into 3 slabs and stack along a leading encoder axis."""
    def one(p, mask):
        # (H, 3*128) bf16, q|k|v each starting on a 128-lane boundary
        wqkv = jnp.concatenate(
            [_pad_lanes(p["wq"], HP), _pad_lanes(p["wk"], HP),
             _pad_lanes(p["wv"], HP)], axis=1).astype(jnp.bfloat16)
        # (H+H+F, F) bf16: rows 0:H wo, H:2H w1, 2H:2H+F w2 (sublane-aligned)
        wslab = jnp.concatenate(
            [_pad_lanes(p["wo"], F), p["w1"], _pad_lanes(p["w2"], F)],
            axis=0).astype(jnp.bfloat16)
        # f32 slab: row 0 bqkv (lane-aligned), rows 1-7 small vectors, rows 8:8+B bias
        bqkv = jnp.concatenate(
            [_pad_lanes(p["bq"], HP), _pad_lanes(p["bk"], HP),
             _pad_lanes(p["bv"], HP)], axis=1)
        rows = [bqkv]
        for name in ("bo", "b2", "g1", "be1", "g2", "be2", "b1"):
            rows.append(_pad_lanes(p[name], 3 * HP))
        rows.append(_pad_lanes(_build_attn_bias(mask), 3 * HP))
        ps = jnp.concatenate(rows, axis=0)
        ps = jnp.pad(ps, ((0, PSLAB_ROWS - ps.shape[0]), (0, 0)))
        return wqkv, wslab, ps

    q = one(q_params, q_mask)
    p = one(p_params, p_mask)
    return tuple(jnp.stack([a, b], axis=0) for a, b in zip(q, p))


def embed(input_ids, token_type_ids, params):
    # Embedding gather is glue; hot path (attention/FFN) lives in the kernel.
    return (params["word_emb"][input_ids]
            + params["type_emb"][token_type_ids]
            + params["pos_emb"][None, :, :]).astype(jnp.float32)


@jax.jit
def biencoder_forward(q_input_ids, q_token_type_ids, q_attention_mask,
                      p_input_ids, p_token_type_ids, p_attention_mask,
                      q_params, p_params):
    xq = _flatten_cls_first(embed(q_input_ids, q_token_type_ids, q_params))
    xp = _flatten_cls_first(embed(p_input_ids, p_token_type_ids, p_params))
    x = jnp.stack([xq, xp], axis=0)                      # (NENC, B*S, H)
    wqkv, wslab, pslab = pack_params(q_params, p_params,
                                     q_attention_mask, p_attention_mask)
    vecs = fused_biencoder(x, wqkv, wslab, pslab)        # (NENC, B, H)
    return vecs[0], vecs[1]


# ---------------------------------------------------------------------------
# Pure-JAX reference (f32, batched) for a loose tolerance check.
# ---------------------------------------------------------------------------
def _encoder_ref(input_ids, token_type_ids, attention_mask, p):
    x = embed(input_ids, token_type_ids, p)                            # (B, S, H)
    q = x @ p["wq"] + p["bq"]
    k = x @ p["wk"] + p["bk"]
    v = x @ p["wv"] + p["bv"]
    s = jnp.einsum("bqh,bkh->bqk", q, k) * (float(H) ** -0.5)
    s = s + (attention_mask[:, None, :].astype(jnp.float32) - 1.0) * NEG
    a = jax.nn.softmax(s, axis=-1)
    attn = jnp.einsum("bqk,bkh->bqh", a, v) @ p["wo"] + p["bo"]
    hid = _layer_norm(x + attn, p["g1"], p["be1"])
    ff = jax.nn.gelu(hid @ p["w1"] + p["b1"], approximate=True)
    out = _layer_norm(hid + ff @ p["w2"] + p["b2"], p["g2"], p["be2"])
    return out[:, 0, :]                                                # (B, H)


# ---------------------------------------------------------------------------
if __name__ == "__main__":
    key = jax.random.PRNGKey(0)
    k_qm, k_pm, k_qi, k_pi = jax.random.split(key, 4)

    q_params = init_encoder_params(k_qm)   # question_model
    p_params = init_encoder_params(k_pm)   # passage_model

    q_input_ids = jax.random.randint(k_qi, (B, S), 0, VOCAB, dtype=jnp.int32)
    p_input_ids = jax.random.randint(k_pi, (B, S), 0, VOCAB, dtype=jnp.int32)
    q_token_type_ids = jnp.zeros((B, S), jnp.int32)
    p_token_type_ids = jnp.zeros((B, S), jnp.int32)
    # simple masks: question pads last 2 tokens, passage is full length
    q_attention_mask = jnp.concatenate(
        [jnp.ones((B, S - 2), jnp.int32), jnp.zeros((B, 2), jnp.int32)], axis=1)
    p_attention_mask = jnp.ones((B, S), jnp.int32)

    q_vec, p_vec = biencoder_forward(
        q_input_ids, q_token_type_ids, q_attention_mask,
        p_input_ids, p_token_type_ids, p_attention_mask,
        q_params, p_params)
    jax.block_until_ready((q_vec, p_vec))

    q_ref = _encoder_ref(q_input_ids, q_token_type_ids, q_attention_mask, q_params)
    p_ref = _encoder_ref(p_input_ids, p_token_type_ids, p_attention_mask, p_params)

    assert q_vec.shape == (B, H) and p_vec.shape == (B, H)
    assert jnp.all(jnp.isfinite(q_vec)) and jnp.all(jnp.isfinite(p_vec))
    # loose tolerance: bf16 MXU inputs + approx reciprocal vs f32 reference
    assert float(jnp.max(jnp.abs(q_vec - q_ref))) < 5e-2
    assert float(jnp.max(jnp.abs(p_vec - p_ref))) < 5e-2
    print("KERNEL_OK")
</pallas_src>

<mosaic_0001>
module attributes {stable_mosaic.version = 11 : i64} {
  func.func @biencoder_kernel(%arg0: memref<2x16x32xf32, #tpu.memory_space<vmem>>, %arg1: memref<2x32x384xbf16, #tpu.memory_space<vmem>>, %arg2: memref<2x128x64xbf16, #tpu.memory_space<vmem>>, %arg3: memref<2x16x384xf32, #tpu.memory_space<vmem>>, %arg4: memref<4x128xf32, #tpu.memory_space<vmem>>) attributes {dimension_semantics = [], scalar_prefetch = 0 : i64, scratch_operands = 0 : i64, tpu.core_type = #tpu.core_type<tc>} {
    %c0 = arith.constant 0 : index
    %c0_0 = arith.constant 0 : index
    %c0_1 = arith.constant 0 : index
    %0 = vector.load %arg0[%c0, %c0_0, %c0_1] : memref<2x16x32xf32, #tpu.memory_space<vmem>>, vector<1x16x32xf32>
    %1 = vector.shape_cast %0 : vector<1x16x32xf32> to vector<16x32xf32>
    %c0_2 = arith.constant 0 : index
    %c0_3 = arith.constant 0 : index
    %c0_4 = arith.constant 0 : index
    %2 = vector.load %arg3[%c0_2, %c0_3, %c0_4] : memref<2x16x384xf32, #tpu.memory_space<vmem>>, vector<1x16x384xf32>
    %3 = vector.shape_cast %2 : vector<1x16x384xf32> to vector<16x384xf32>
    %4 = vector.extract_strided_slice %3 {offsets = [0, 0], sizes = [1, 384], strides = [1, 1]} : vector<16x384xf32> to vector<1x384xf32>
    %5 = vector.extract_strided_slice %3 {offsets = [1, 0], sizes = [1, 32], strides = [1, 1]} : vector<16x384xf32> to vector<1x32xf32>
    %6 = vector.extract_strided_slice %3 {offsets = [2, 0], sizes = [1, 32], strides = [1, 1]} : vector<16x384xf32> to vector<1x32xf32>
    %7 = vector.extract_strided_slice %3 {offsets = [3, 0], sizes = [1, 32], strides = [1, 1]} : vector<16x384xf32> to vector<1x32xf32>
    %8 = vector.extract_strided_slice %3 {offsets = [4, 0], sizes = [1, 32], strides = [1, 1]} : vector<16x384xf32> to vector<1x32xf32>
    %9 = vector.extract_strided_slice %3 {offsets = [5, 0], sizes = [1, 32], strides = [1, 1]} : vector<16x384xf32> to vector<1x32xf32>
    %10 = vector.extract_strided_slice %3 {offsets = [6, 0], sizes = [1, 32], strides = [1, 1]} : vector<16x384xf32> to vector<1x32xf32>
    %11 = vector.extract_strided_slice %3 {offsets = [7, 0], sizes = [1, 64], strides = [1, 1]} : vector<16x384xf32> to vector<1x64xf32>
    %12 = vector.extract_strided_slice %3 {offsets = [8, 0], sizes = [2, 16], strides = [1, 1]} : vector<16x384xf32> to vector<2x16xf32>
    %c0_5 = arith.constant 0 : index
    %c0_6 = arith.constant 0 : index
    %c0_7 = arith.constant 0 : index
    %13 = vector.load %arg2[%c0_5, %c0_6, %c0_7] : memref<2x128x64xbf16, #tpu.memory_space<vmem>>, vector<1x128x64xbf16>
    %14 = vector.shape_cast %13 : vector<1x128x64xbf16> to vector<128x64xbf16>
    %15 = vector.extract_strided_slice %14 {offsets = [0, 0], sizes = [32, 32], strides = [1, 1]} : vector<128x64xbf16> to vector<32x32xbf16>
    %16 = vector.extract_strided_slice %14 {offsets = [32, 0], sizes = [32, 64], strides = [1, 1]} : vector<128x64xbf16> to vector<32x64xbf16>
    %17 = vector.extract_strided_slice %14 {offsets = [64, 0], sizes = [64, 32], strides = [1, 1]} : vector<128x64xbf16> to vector<64x32xbf16>
    %18 = arith.truncf %1 : vector<16x32xf32> to vector<16x32xbf16>
    %c0_8 = arith.constant 0 : index
    %c0_9 = arith.constant 0 : index
    %c0_10 = arith.constant 0 : index
    %19 = vector.load %arg1[%c0_8, %c0_9, %c0_10] : memref<2x32x384xbf16, #tpu.memory_space<vmem>>, vector<1x32x384xbf16>
    %20 = vector.shape_cast %19 : vector<1x32x384xbf16> to vector<32x384xbf16>
    %cst = arith.constant dense<0.000000e+00> : vector<16x384xf32>
    %21 = tpu.matmul %18, %20, %cst {dimension_numbers = #tpu.dot_dimension_numbers<[1], [0], [0], [1], [0, 0, 1, 1], [], []>} : vector<16x32xbf16>, vector<32x384xbf16>, vector<16x384xf32> -> vector<16x384xf32>
    %22 = vector.broadcast %4 : vector<1x384xf32> to vector<16x384xf32>
    %23 = arith.addf %21, %22 : vector<16x384xf32>
    %24 = vector.extract_strided_slice %23 {offsets = [0, 0], sizes = [2, 128], strides = [1, 1]} : vector<16x384xf32> to vector<2x128xf32>
    %25 = vector.extract_strided_slice %23 {offsets = [0, 128], sizes = [16, 128], strides = [1, 1]} : vector<16x384xf32> to vector<16x128xf32>
    %26 = vector.extract_strided_slice %23 {offsets = [0, 256], sizes = [16, 128], strides = [1, 1]} : vector<16x384xf32> to vector<16x128xf32>
    %27 = arith.truncf %24 : vector<2x128xf32> to vector<2x128xbf16>
    %28 = arith.truncf %25 : vector<16x128xf32> to vector<16x128xbf16>
    %cst_11 = arith.constant dense<0.000000e+00> : vector<2x16xf32>
    %29 = tpu.matmul %27, %28, %cst_11 {dimension_numbers = #tpu.dot_dimension_numbers<[1], [1], [0], [0], [0, 0, 1, 0], [], []>} : vector<2x128xbf16>, vector<16x128xbf16>, vector<2x16xf32> -> vector<2x16xf32>
    %cst_12 = arith.constant 0.176776692 : f32
    %30 = vector.broadcast %cst_12 : f32 to vector<2x16xf32>
    %31 = arith.mulf %29, %30 : vector<2x16xf32>
    %32 = arith.addf %31, %12 : vector<2x16xf32>
    %cst_13 = arith.constant dense<0xFF800000> : vector<2xf32>
    %33 = vector.multi_reduction <maximumf>, %32, %cst_13 [1] : vector<2x16xf32> to vector<2xf32>
    %34 = vector.shape_cast %33 : vector<2xf32> to vector<2x1xf32>
    %35 = vector.broadcast %34 : vector<2x1xf32> to vector<2x16xf32>
    %36 = arith.subf %32, %35 : vector<2x16xf32>
    %37 = math.exp %36 : vector<2x16xf32>
    %cst_14 = arith.constant dense<0.000000e+00> : vector<2xf32>
    %38 = vector.multi_reduction <add>, %37, %cst_14 [1] : vector<2x16xf32> to vector<2xf32>
    %39 = vector.shape_cast %38 : vector<2xf32> to vector<2x1xf32>
    %40 = tpu.reciprocal %39 {approx = true} : vector<2x1xf32> -> vector<2x1xf32>
    %41 = vector.broadcast %40 : vector<2x1xf32> to vector<2x16xf32>
    %42 = arith.mulf %37, %41 : vector<2x16xf32>
    %43 = arith.truncf %42 : vector<2x16xf32> to vector<2x16xbf16>
    %44 = arith.truncf %26 : vector<16x128xf32> to vector<16x128xbf16>
    %cst_15 = arith.constant dense<0.000000e+00> : vector<2x128xf32>
    %45 = tpu.matmul %43, %44, %cst_15 {dimension_numbers = #tpu.dot_dimension_numbers<[1], [0], [0], [1], [0, 0, 1, 1], [], []>} : vector<2x16xbf16>, vector<16x128xbf16>, vector<2x128xf32> -> vector<2x128xf32>
    %46 = vector.extract_strided_slice %45 {offsets = [0, 0], sizes = [2, 32], strides = [1, 1]} : vector<2x128xf32> to vector<2x32xf32>
    %47 = arith.truncf %46 : vector<2x32xf32> to vector<2x32xbf16>
    %cst_16 = arith.constant dense<0.000000e+00> : vector<2x32xf32>
    %48 = tpu.matmul %47, %15, %cst_16 {dimension_numbers = #tpu.dot_dimension_numbers<[1], [0], [0], [1], [0, 0, 1, 1], [], []>} : vector<2x32xbf16>, vector<32x32xbf16>, vector<2x32xf32> -> vector<2x32xf32>
    %49 = vector.broadcast %5 : vector<1x32xf32> to vector<2x32xf32>
    %50 = arith.addf %48, %49 : vector<2x32xf32>
    %51 = vector.extract_strided_slice %1 {offsets = [0, 0], sizes = [2, 32], strides = [1, 1]} : vector<16x32xf32> to vector<2x32xf32>
    %52 = arith.addf %51, %50 : vector<2x32xf32>
    %cst_17 = arith.constant dense<0.000000e+00> : vector<2xf32>
    %53 = vector.multi_reduction <add>, %52, %cst_17 [1] : vector<2x32xf32> to vector<2xf32>
    %54 = vector.shape_cast %53 : vector<2xf32> to vector<2x1xf32>
    %cst_18 = arith.constant 3.200000e+01 : f32
    %55 = vector.broadcast %cst_18 : f32 to vector<2x1xf32>
    %56 = arith.divf %54, %55 : vector<2x1xf32>
    %57 = vector.broadcast %56 : vector<2x1xf32> to vector<2x32xf32>
    %58 = arith.subf %52, %57 : vector<2x32xf32>
    %59 = arith.mulf %58, %58 : vector<2x32xf32>
    %cst_19 = arith.constant dense<0.000000e+00> : vector<2xf32>
    %60 = vector.multi_reduction <add>, %59, %cst_19 [1] : vector<2x32xf32> to vector<2xf32>
    %61 = vector.shape_cast %60 : vector<2xf32> to vector<2x1xf32>
    %cst_20 = arith.constant 3.200000e+01 : f32
    %62 = vector.broadcast %cst_20 : f32 to vector<2x1xf32>
    %63 = arith.divf %61, %62 : vector<2x1xf32>
    %64 = vector.broadcast %56 : vector<2x1xf32> to vector<2x32xf32>
    %65 = arith.subf %52, %64 : vector<2x32xf32>
    %cst_21 = arith.constant 9.99999996E-13 : f32
    %66 = vector.broadcast %cst_21 : f32 to vector<2x1xf32>
    %67 = arith.addf %63, %66 : vector<2x1xf32>
    %68 = math.rsqrt %67 : vector<2x1xf32>
    %69 = vector.broadcast %68 : vector<2x1xf32> to vector<2x32xf32>
    %70 = arith.mulf %65, %69 : vector<2x32xf32>
    %71 = vector.broadcast %7 : vector<1x32xf32> to vector<2x32xf32>
    %72 = arith.mulf %70, %71 : vector<2x32xf32>
    %73 = vector.broadcast %8 : vector<1x32xf32> to vector<2x32xf32>
    %74 = arith.addf %72, %73 : vector<2x32xf32>
    %75 = arith.truncf %74 : vector<2x32xf32> to vector<2x32xbf16>
    %cst_22 = arith.constant dense<0.000000e+00> : vector<2x64xf32>
    %76 = tpu.matmul %75, %16, %cst_22 {dimension_numbers = #tpu.dot_dimension_numbers<[1], [0], [0], [1], [0, 0, 1, 1], [], []>} : vector<2x32xbf16>, vector<32x64xbf16>, vector<2x64xf32> -> vector<2x64xf32>
    %77 = vector.broadcast %11 : vector<1x64xf32> to vector<2x64xf32>
    %78 = arith.addf %76, %77 : vector<2x64xf32>
    %79 = arith.mulf %78, %78 : vector<2x64xf32>
    %80 = arith.mulf %78, %79 : vector<2x64xf32>
    %cst_23 = arith.constant 4.471500e-02 : f32
    %81 = vector.broadcast %cst_23 : f32 to vector<2x64xf32>
    %82 = arith.mulf %81, %80 : vector<2x64xf32>
    %83 = arith.addf %78, %82 : vector<2x64xf32>
    %cst_24 = arith.constant 0.797884583 : f32
    %84 = vector.broadcast %cst_24 : f32 to vector<2x64xf32>
    %85 = arith.mulf %84, %83 : vector<2x64xf32>
    %86 = math.tanh %85 : vector<2x64xf32>
    %cst_25 = arith.constant 1.000000e+00 : f32
    %87 = vector.broadcast %cst_25 : f32 to vector<2x64xf32>
    %88 = arith.addf %87, %86 : vector<2x64xf32>
    %cst_26 = arith.constant 5.000000e-01 : f32
    %89 = vector.broadcast %cst_26 : f32 to vector<2x64xf32>
    %90 = arith.mulf %89, %88 : vector<2x64xf32>
    %91 = arith.mulf %78, %90 : vector<2x64xf32>
    %92 = arith.truncf %91 : vector<2x64xf32> to vector<2x64xbf16>
    %cst_27 = arith.constant dense<0.000000e+00> : vector<2x32xf32>
    %93 = tpu.matmul %92, %17, %cst_27 {dimension_numbers = #tpu.dot_dimension_numbers<[1], [0], [0], [1], [0, 0, 1, 1], [], []>} : vector<2x64xbf16>, vector<64x32xbf16>, vector<2x32xf32> -> vector<2x32xf32>
    %94 = vector.broadcast %6 : vector<1x32xf32> to vector<2x32xf32>
    %95 = arith.addf %93, %94 : vector<2x32xf32>
    %96 = arith.addf %74, %95 : vector<2x32xf32>
    %cst_28 = arith.constant dense<0.000000e+00> : vector<2xf32>
    %97 = vector.multi_reduction <add>, %96, %cst_28 [1] : vector<2x32xf32> to vector<2xf32>
    %98 = vector.shape_cast %97 : vector<2xf32> to vector<2x1xf32>
    %cst_29 = arith.constant 3.200000e+01 : f32
    %99 = vector.broadcast %cst_29 : f32 to vector<2x1xf32>
    %100 = arith.divf %98, %99 : vector<2x1xf32>
    %101 = vector.broadcast %100 : vector<2x1xf32> to vector<2x32xf32>
    %102 = arith.subf %96, %101 : vector<2x32xf32>
    %103 = arith.mulf %102, %102 : vector<2x32xf32>
    %cst_30 = arith.constant dense<0.000000e+00> : vector<2xf32>
    %104 = vector.multi_reduction <add>, %103, %cst_30 [1] : vector<2x32xf32> to vector<2xf32>
    %105 = vector.shape_cast %104 : vector<2xf32> to vector<2x1xf32>
    %cst_31 = arith.constant 3.200000e+01 : f32
    %106 = vector.broadcast %cst_31 : f32 to vector<2x1xf32>
    %107 = arith.divf %105, %106 : vector<2x1xf32>
    %108 = vector.broadcast %100 : vector<2x1xf32> to vector<2x32xf32>
    %109 = arith.subf %96, %108 : vector<2x32xf32>
    %cst_32 = arith.constant 9.99999996E-13 : f32
    %110 = vector.broadcast %cst_32 : f32 to vector<2x1xf32>
    %111 = arith.addf %107, %110 : vector<2x1xf32>
    %112 = math.rsqrt %111 : vector<2x1xf32>
    %113 = vector.broadcast %112 : vector<2x1xf32> to vector<2x32xf32>
    %114 = arith.mulf %109, %113 : vector<2x32xf32>
    %115 = vector.broadcast %9 : vector<1x32xf32> to vector<2x32xf32>
    %116 = arith.mulf %114, %115 : vector<2x32xf32>
    %117 = vector.broadcast %10 : vector<1x32xf32> to vector<2x32xf32>
    %118 = arith.addf %116, %117 : vector<2x32xf32>
    %c1 = arith.constant 1 : index
    %c0_33 = arith.constant 0 : index
    %c0_34 = arith.constant 0 : index
    %119 = vector.load %arg0[%c1, %c0_33, %c0_34] : memref<2x16x32xf32, #tpu.memory_space<vmem>>, vector<1x16x32xf32>
    %120 = vector.shape_cast %119 : vector<1x16x32xf32> to vector<16x32xf32>
    %c1_35 = arith.constant 1 : index
    %c0_36 = arith.constant 0 : index
    %c0_37 = arith.constant 0 : index
    %121 = vector.load %arg3[%c1_35, %c0_36, %c0_37] : memref<2x16x384xf32, #tpu.memory_space<vmem>>, vector<1x16x384xf32>
    %122 = vector.shape_cast %121 : vector<1x16x384xf32> to vector<16x384xf32>
    %123 = vector.extract_strided_slice %122 {offsets = [0, 0], sizes = [1, 384], strides = [1, 1]} : vector<16x384xf32> to vector<1x384xf32>
    %124 = vector.extract_strided_slice %122 {offsets = [1, 0], sizes = [1, 32], strides = [1, 1]} : vector<16x384xf32> to vector<1x32xf32>
    %125 = vector.extract_strided_slice %122 {offsets = [2, 0], sizes = [1, 32], strides = [1, 1]} : vector<16x384xf32> to vector<1x32xf32>
    %126 = vector.extract_strided_slice %122 {offsets = [3, 0], sizes = [1, 32], strides = [1, 1]} : vector<16x384xf32> to vector<1x32xf32>
    %127 = vector.extract_strided_slice %122 {offsets = [4, 0], sizes = [1, 32], strides = [1, 1]} : vector<16x384xf32> to vector<1x32xf32>
    %128 = vector.extract_strided_slice %122 {offsets = [5, 0], sizes = [1, 32], strides = [1, 1]} : vector<16x384xf32> to vector<1x32xf32>
    %129 = vector.extract_strided_slice %122 {offsets = [6, 0], sizes = [1, 32], strides = [1, 1]} : vector<16x384xf32> to vector<1x32xf32>
    %130 = vector.extract_strided_slice %122 {offsets = [7, 0], sizes = [1, 64], strides = [1, 1]} : vector<16x384xf32> to vector<1x64xf32>
    %131 = vector.extract_strided_slice %122 {offsets = [8, 0], sizes = [2, 16], strides = [1, 1]} : vector<16x384xf32> to vector<2x16xf32>
    %c1_38 = arith.constant 1 : index
    %c0_39 = arith.constant 0 : index
    %c0_40 = arith.constant 0 : index
    %132 = vector.load %arg2[%c1_38, %c0_39, %c0_40] : memref<2x128x64xbf16, #tpu.memory_space<vmem>>, vector<1x128x64xbf16>
    %133 = vector.shape_cast %132 : vector<1x128x64xbf16> to vector<128x64xbf16>
    %134 = vector.extract_strided_slice %133 {offsets = [0, 0], sizes = [32, 32], strides = [1, 1]} : vector<128x64xbf16> to vector<32x32xbf16>
    %135 = vector.extract_strided_slice %133 {offsets = [32, 0], sizes = [32, 64], strides = [1, 1]} : vector<128x64xbf16> to vector<32x64xbf16>
    %136 = vector.extract_strided_slice %133 {offsets = [64, 0], sizes = [64, 32], strides = [1, 1]} : vector<128x64xbf16> to vector<64x32xbf16>
    %137 = arith.truncf %120 : vector<16x32xf32> to vector<16x32xbf16>
    %c1_41 = arith.constant 1 : index
    %c0_42 = arith.constant 0 : index
    %c0_43 = arith.constant 0 : index
    %138 = vector.load %arg1[%c1_41, %c0_42, %c0_43] : memref<2x32x384xbf16, #tpu.memory_space<vmem>>, vector<1x32x384xbf16>
    %139 = vector.shape_cast %138 : vector<1x32x384xbf16> to vector<32x384xbf16>
    %cst_44 = arith.constant dense<0.000000e+00> : vector<16x384xf32>
    %140 = tpu.matmul %137, %139, %cst_44 {dimension_numbers = #tpu.dot_dimension_numbers<[1], [0], [0], [1], [0, 0, 1, 1], [], []>} : vector<16x32xbf16>, vector<32x384xbf16>, vector<16x384xf32> -> vector<16x384xf32>
    %141 = vector.broadcast %123 : vector<1x384xf32> to vector<16x384xf32>
    %142 = arith.addf %140, %141 : vector<16x384xf32>
    %143 = vector.extract_strided_slice %142 {offsets = [0, 0], sizes = [2, 128], strides = [1, 1]} : vector<16x384xf32> to vector<2x128xf32>
    %144 = vector.extract_strided_slice %142 {offsets = [0, 128], sizes = [16, 128], strides = [1, 1]} : vector<16x384xf32> to vector<16x128xf32>
    %145 = vector.extract_strided_slice %142 {offsets = [0, 256], sizes = [16, 128], strides = [1, 1]} : vector<16x384xf32> to vector<16x128xf32>
    %146 = arith.truncf %143 : vector<2x128xf32> to vector<2x128xbf16>
    %147 = arith.truncf %144 : vector<16x128xf32> to vector<16x128xbf16>
    %cst_45 = arith.constant dense<0.000000e+00> : vector<2x16xf32>
    %148 = tpu.matmul %146, %147, %cst_45 {dimension_numbers = #tpu.dot_dimension_numbers<[1], [1], [0], [0], [0, 0, 1, 0], [], []>} : vector<2x128xbf16>, vector<16x128xbf16>, vector<2x16xf32> -> vector<2x16xf32>
    %cst_46 = arith.constant 0.176776692 : f32
    %149 = vector.broadcast %cst_46 : f32 to vector<2x16xf32>
    %150 = arith.mulf %148, %149 : vector<2x16xf32>
    %151 = arith.addf %150, %131 : vector<2x16xf32>
    %cst_47 = arith.constant dense<0xFF800000> : vector<2xf32>
    %152 = vector.multi_reduction <maximumf>, %151, %cst_47 [1] : vector<2x16xf32> to vector<2xf32>
    %153 = vector.shape_cast %152 : vector<2xf32> to vector<2x1xf32>
    %154 = vector.broadcast %153 : vector<2x1xf32> to vector<2x16xf32>
    %155 = arith.subf %151, %154 : vector<2x16xf32>
    %156 = math.exp %155 : vector<2x16xf32>
    %cst_48 = arith.constant dense<0.000000e+00> : vector<2xf32>
    %157 = vector.multi_reduction <add>, %156, %cst_48 [1] : vector<2x16xf32> to vector<2xf32>
    %158 = vector.shape_cast %157 : vector<2xf32> to vector<2x1xf32>
    %159 = tpu.reciprocal %158 {approx = true} : vector<2x1xf32> -> vector<2x1xf32>
    %160 = vector.broadcast %159 : vector<2x1xf32> to vector<2x16xf32>
    %161 = arith.mulf %156, %160 : vector<2x16xf32>
    %162 = arith.truncf %161 : vector<2x16xf32> to vector<2x16xbf16>
    %163 = arith.truncf %145 : vector<16x128xf32> to vector<16x128xbf16>
    %cst_49 = arith.constant dense<0.000000e+00> : vector<2x128xf32>
    %164 = tpu.matmul %162, %163, %cst_49 {dimension_numbers = #tpu.dot_dimension_numbers<[1], [0], [0], [1], [0, 0, 1, 1], [], []>} : vector<2x16xbf16>, vector<16x128xbf16>, vector<2x128xf32> -> vector<2x128xf32>
    %165 = vector.extract_strided_slice %164 {offsets = [0, 0], sizes = [2, 32], strides = [1, 1]} : vector<2x128xf32> to vector<2x32xf32>
    %166 = arith.truncf %165 : vector<2x32xf32> to vector<2x32xbf16>
    %cst_50 = arith.constant dense<0.000000e+00> : vector<2x32xf32>
    %167 = tpu.matmul %166, %134, %cst_50 {dimension_numbers = #tpu.dot_dimension_numbers<[1], [0], [0], [1], [0, 0, 1, 1], [], []>} : vector<2x32xbf16>, vector<32x32xbf16>, vector<2x32xf32> -> vector<2x32xf32>
    %168 = vector.broadcast %124 : vector<1x32xf32> to vector<2x32xf32>
    %169 = arith.addf %167, %168 : vector<2x32xf32>
    %170 = vector.extract_strided_slice %120 {offsets = [0, 0], sizes = [2, 32], strides = [1, 1]} : vector<16x32xf32> to vector<2x32xf32>
    %171 = arith.addf %170, %169 : vector<2x32xf32>
    %cst_51 = arith.constant dense<0.000000e+00> : vector<2xf32>
    %172 = vector.multi_reduction <add>, %171, %cst_51 [1] : vector<2x32xf32> to vector<2xf32>
    %173 = vector.shape_cast %172 : vector<2xf32> to vector<2x1xf32>
    %cst_52 = arith.constant 3.200000e+01 : f32
    %174 = vector.broadcast %cst_52 : f32 to vector<2x1xf32>
    %175 = arith.divf %173, %174 : vector<2x1xf32>
    %176 = vector.broadcast %175 : vector<2x1xf32> to vector<2x32xf32>
    %177 = arith.subf %171, %176 : vector<2x32xf32>
    %178 = arith.mulf %177, %177 : vector<2x32xf32>
    %cst_53 = arith.constant dense<0.000000e+00> : vector<2xf32>
    %179 = vector.multi_reduction <add>, %178, %cst_53 [1] : vector<2x32xf32> to vector<2xf32>
    %180 = vector.shape_cast %179 : vector<2xf32> to vector<2x1xf32>
    %cst_54 = arith.constant 3.200000e+01 : f32
    %181 = vector.broadcast %cst_54 : f32 to vector<2x1xf32>
    %182 = arith.divf %180, %181 : vector<2x1xf32>
    %183 = vector.broadcast %175 : vector<2x1xf32> to vector<2x32xf32>
    %184 = arith.subf %171, %183 : vector<2x32xf32>
    %cst_55 = arith.constant 9.99999996E-13 : f32
    %185 = vector.broadcast %cst_55 : f32 to vector<2x1xf32>
    %186 = arith.addf %182, %185 : vector<2x1xf32>
    %187 = math.rsqrt %186 : vector<2x1xf32>
    %188 = vector.broadcast %187 : vector<2x1xf32> to vector<2x32xf32>
    %189 = arith.mulf %184, %188 : vector<2x32xf32>
    %190 = vector.broadcast %126 : vector<1x32xf32> to vector<2x32xf32>
    %191 = arith.mulf %189, %190 : vector<2x32xf32>
    %192 = vector.broadcast %127 : vector<1x32xf32> to vector<2x32xf32>
    %193 = arith.addf %191, %192 : vector<2x32xf32>
    %194 = arith.truncf %193 : vector<2x32xf32> to vector<2x32xbf16>
    %cst_56 = arith.constant dense<0.000000e+00> : vector<2x64xf32>
    %195 = tpu.matmul %194, %135, %cst_56 {dimension_numbers = #tpu.dot_dimension_numbers<[1], [0], [0], [1], [0, 0, 1, 1], [], []>} : vector<2x32xbf16>, vector<32x64xbf16>, vector<2x64xf32> -> vector<2x64xf32>
    %196 = vector.broadcast %130 : vector<1x64xf32> to vector<2x64xf32>
    %197 = arith.addf %195, %196 : vector<2x64xf32>
    %198 = arith.mulf %197, %197 : vector<2x64xf32>
    %199 = arith.mulf %197, %198 : vector<2x64xf32>
    %cst_57 = arith.constant 4.471500e-02 : f32
    %200 = vector.broadcast %cst_57 : f32 to vector<2x64xf32>
    %201 = arith.mulf %200, %199 : vector<2x64xf32>
    %202 = arith.addf %197, %201 : vector<2x64xf32>
    %cst_58 = arith.constant 0.797884583 : f32
    %203 = vector.broadcast %cst_58 : f32 to vector<2x64xf32>
    %204 = arith.mulf %203, %202 : vector<2x64xf32>
    %205 = math.tanh %204 : vector<2x64xf32>
    %cst_59 = arith.constant 1.000000e+00 : f32
    %206 = vector.broadcast %cst_59 : f32 to vector<2x64xf32>
    %207 = arith.addf %206, %205 : vector<2x64xf32>
    %cst_60 = arith.constant 5.000000e-01 : f32
    %208 = vector.broadcast %cst_60 : f32 to vector<2x64xf32>
    %209 = arith.mulf %208, %207 : vector<2x64xf32>
    %210 = arith.mulf %197, %209 : vector<2x64xf32>
    %211 = arith.truncf %210 : vector<2x64xf32> to vector<2x64xbf16>
    %cst_61 = arith.constant dense<0.000000e+00> : vector<2x32xf32>
    %212 = tpu.matmul %211, %136, %cst_61 {dimension_numbers = #tpu.dot_dimension_numbers<[1], [0], [0], [1], [0, 0, 1, 1], [], []>} : vector<2x64xbf16>, vector<64x32xbf16>, vector<2x32xf32> -> vector<2x32xf32>
    %213 = vector.broadcast %125 : vector<1x32xf32> to vector<2x32xf32>
    %214 = arith.addf %212, %213 : vector<2x32xf32>
    %215 = arith.addf %193, %214 : vector<2x32xf32>
    %cst_62 = arith.constant dense<0.000000e+00> : vector<2xf32>
    %216 = vector.multi_reduction <add>, %215, %cst_62 [1] : vector<2x32xf32> to vector<2xf32>
    %217 = vector.shape_cast %216 : vector<2xf32> to vector<2x1xf32>
    %cst_63 = arith.constant 3.200000e+01 : f32
    %218 = vector.broadcast %cst_63 : f32 to vector<2x1xf32>
    %219 = arith.divf %217, %218 : vector<2x1xf32>
    %220 = vector.broadcast %219 : vector<2x1xf32> to vector<2x32xf32>
    %221 = arith.subf %215, %220 : vector<2x32xf32>
    %222 = arith.mulf %221, %221 : vector<2x32xf32>
    %cst_64 = arith.constant dense<0.000000e+00> : vector<2xf32>
    %223 = vector.multi_reduction <add>, %222, %cst_64 [1] : vector<2x32xf32> to vector<2xf32>
    %224 = vector.shape_cast %223 : vector<2xf32> to vector<2x1xf32>
    %cst_65 = arith.constant 3.200000e+01 : f32
    %225 = vector.broadcast %cst_65 : f32 to vector<2x1xf32>
    %226 = arith.divf %224, %225 : vector<2x1xf32>
    %227 = vector.broadcast %219 : vector<2x1xf32> to vector<2x32xf32>
    %228 = arith.subf %215, %227 : vector<2x32xf32>
    %cst_66 = arith.constant 9.99999996E-13 : f32
    %229 = vector.broadcast %cst_66 : f32 to vector<2x1xf32>
    %230 = arith.addf %226, %229 : vector<2x1xf32>
    %231 = math.rsqrt %230 : vector<2x1xf32>
    %232 = vector.broadcast %231 : vector<2x1xf32> to vector<2x32xf32>
    %233 = arith.mulf %228, %232 : vector<2x32xf32>
    %234 = vector.broadcast %128 : vector<1x32xf32> to vector<2x32xf32>
    %235 = arith.mulf %233, %234 : vector<2x32xf32>
    %236 = vector.broadcast %129 : vector<1x32xf32> to vector<2x32xf32>
    %237 = arith.addf %235, %236 : vector<2x32xf32>
    %238 = tpu.concatenate %118, %237 in 0 : vector<2x32xf32>, vector<2x32xf32> -> vector<4x32xf32>
    %cst_67 = arith.constant 0.000000e+00 : f32
    %239 = vector.broadcast %cst_67 : f32 to vector<4x96xf32>
    %240 = tpu.concatenate %238, %239 in 1 : vector<4x32xf32>, vector<4x96xf32> -> vector<4x128xf32>
    %c0_68 = arith.constant 0 : index
    %c0_69 = arith.constant 0 : index
    %241 = vector.load %arg4[%c0_68, %c0_69] : memref<4x128xf32, #tpu.memory_space<vmem>>, vector<4x128xf32>
    tpu.vector_store %arg4[%c0_68, %c0_69], %240 {strides = array<i32>} : memref<4x128xf32, #tpu.memory_space<vmem>>, vector<4x128xf32>,
    return
  }
}

</mosaic_0001>

<bundles_post_ra>
// kernel: tile.13
= control target key start
LH: loop header
LB: loop body
LE: loop exit
PB: predicated region body
PF: predicated region fallthrough
CT: control target
= control target key end

     0   :  { %s22_s0 = inlined_call_operand.vmem [shape: s32[7], index: 0, kind: input, shape index: {}]   ;;  %s23_s1 = inlined_call_operand.vmem [shape: s32[2,7], index: 1, kind: output, shape index: {}]  }
   0x1   :  { %v4_v0 = vld [vmem:[%s22_s0] ss:$0 sm:$0xff] }
   0x2   :  { %5 = vst [vmem:[%s23_s1] sm:$0x3] %v4_v0 }

// kernel: tile.14
= control target key start
LH: loop header
LB: loop body
LE: loop exit
PB: predicated region body
PF: predicated region fallthrough
CT: control target
= control target key end

     0   :  { %vm7_vm0 = vcmask 56320   ;;  %vm13_vm1 = vcmask 113720   ;;  %s39_s0 = inlined_call_operand.vmem [shape: s32[2,7], index: 0, kind: input, shape index: {}]   ;;  %s40_s1 = inlined_call_operand.vmem [shape: s32[14], index: 1, kind: output, shape index: {}]  }
   0x1   :  { %v4_v0 = vld [vmem:[%s39_s0] sm:$0x3]  ;;  %s22_s0 = smov 7  }
   0x2   :  { %5 = vst [vmem:[#allocation1] sm:$0x3] %v4_v0 }
   0x9   :  { %v10_v1 = vld [vmem:[#allocation1 + $0x1] sm:$0x1]   ;;  %v6_v2 = vld [vmem:[#allocation1] sm:$0x1]  }
   0xa   :  { %11 = vrot.lane.b32.xlu0 %v10_v1, %s22_s0  ;;  %8 = vst.msk [vmem:[#allocation0] sm:$0x1] %vm7_vm0, %v6_v2  }
  0x7c   :  { %v12_v3 = vpop.permute.xlu0 %11  }
  0x7d   :  { %14 = vst.msk [vmem:[#allocation0] sm:$0x1] %vm13_vm1, %v12_v3  }
  0x84   :  { %v18_v4 = vld [vmem:[#allocation0] sm:$0x1] }
  0x85   :  { %20 = vst [vmem:[%s40_s1] sm:$0x1] %v18_v4 }

// kernel: biencoder_forward.1
= control target key start
LH: loop header
LB: loop body
LE: loop exit
PB: predicated region body
PF: predicated region fallthrough
CT: control target
= control target key end

     0   :  { %v1316_v1 = vmov 0   ;;  %vm93_vm0 = vcmask 261120   ;;  %v1317_v8 = vmov 0.0   ;;  %vm1318_vm1 = vmmov 0   ;;  %s1621_s1 = inlined_call_operand.vmem [shape: bf16[2,32,384], index: 1, kind: input, shape index: {}]   ;;  %s1622_s0 = inlined_call_operand.vmem [shape: f32[2,16,32], index: 0, kind: input, shape index: {}]   ;;  %s1623_s3 = inlined_call_operand.vmem [shape: f32[2,16,384], index: 3, kind: input, shape index: {}]   ;;  %s1624_s2 = inlined_call_operand.vmem [shape: bf16[2,128,64], index: 2, kind: input, shape index: {}]   ;;  %s1625_s4 = inlined_call_operand.vmem [shape: f32[4,128], index: 4, kind: output, shape index: {}]  }
   0x1   :  { %v1264_v0 = vld [vmem:[%s1621_s1 + $0x4] ss:$12 sps:$4 sm:$0xff]   ;;  %129 = vmatprep.mubr.bf16.mxu1 %v1316_v1  ;;  %v1266_v2 = vld [vmem:[%s1621_s1] ss:$12 sps:$4 sm:$0xff]   ;;  %v1267_v3 = vld [vmem:[%s1621_s1 + $0x1c] ss:$12 sps:$4 sm:$0xff]   ;;  %1173 = vmatprep.subr.bf16.mxu0 %v1317_v8  ;;  %v49_v9 = vlaneseq }
   0x2   :  { %97 = vmatprep.subr.bf16.mxu1 %v1264_v0  ;;  %v1269_v4 = vld [vmem:[%s1621_s1 + $0x18] ss:$12 sps:$4 sm:$0xff]   ;;  %v19_v6 = vld [vmem:[%s1622_s0 + $0x8] sm:$0xff]  ;;  %1175 = vmatprep.mubr.msk.bf16.mxu0 %vm1318_vm1, %v1317_v8  ;;  %vm224_vm2 = vcmask 123904   ;;  %v22_v35 = vld [vmem:[%s1623_s3 + $0x10] sm:$0xff]  ;;  %vm238_vm3 = vcmask 130048  }
   0x3   :  { %98 = vmatpush1.bf16.msra.mxu1 %v1266_v2  ;;  %v1360_v5 = vld [vmem:[%s1622_s0] sm:$0xff]  ;;  %v1373_v10 = vshrl.u32 %v49_v9, 7  ;;  %v21_v12 = vld [vmem:[%s1623_s3 + $0x8] sm:$0xff]  ;;  %v23_v28 = vld [vmem:[%s1623_s3 + $0x18] sm:$0xff]  ;;  %vm343_vm4 = vcmask 254976   ;;  %vm466_vm5 = vcmask 523264  }
   0x4   :  { %99 = vmatprep.subr.bf16.mxu1 %v1267_v3  ;;  %v40_v7 = vpack.c.bf16 %v19_v6, %v1360_v5  ;;  %v1385_v16 = vld [vmem:[%s1623_s3] sm:$0xff]  ;;  %v1270_v25 = vld [vmem:[%s1621_s1 + $0x8] ss:$12 sps:$4 sm:$0xff]   ;;  %vm1051_vm6 = vcmask 1041408  }
   0x5   :  { %v1376_v11 = vsub.s32 0, %v1373_v10  ;;  %v1271_v26 = vld [vmem:[%s1621_s1 + $0x20] ss:$12 sps:$4 sm:$0xff]   ;;  %v285_v60 = vsub.s32 1, %v1373_v10 }
   0x6   :  { %v1272_v49 = vld [vmem:[%s1624_s2] sm:$0xff]   ;;  %v1273_v50 = vld [vmem:[%s1624_s2 + $0x8] sm:$0xff]  }
   0x7   :  { %100 = vmatpush1.bf16.msra.mxu1 %v1269_v4  ;;  %v56_v14 = vrot.slane %v21_v12, %v1376_v11  ;;  %v52_v21 = vrot.slane %v1385_v16, %v1376_v11  ;;  %v60_v36 = vrot.slane %v22_v35, %v1376_v11  ;;  %v286_v61 = vrot.slane %v1385_v16, %v285_v60 }
   0x8   :  { %1165 = vmatprep.subr.bf16.mxu1 %v1317_v8 }
   0xa   :  { %1065 = vmatmul.mubr.msk.bf16.vlgmr.msra.gmra.mrb[0].mxu1 %vm93_vm0, %v40_v7 }
   0xb   :  { %1169 = vmatprep.mubr.msk.bf16.mxu1 %vm1318_vm1, %v1317_v8  ;;  %1166 = vmatpush3.bf16.msra.mxu1 %v1270_v25 }
   0xc   :  { %1167 = vmatprep.subr.bf16.mxu1 %v1317_v8 }
   0xf   :  { %1168 = vmatpush3.bf16.msra.mxu1 %v1271_v26 }
  0x10   :  { %1179 = vmatprep.subr.bf16.mxu1 %v1317_v8 }
  0x12   :  { %1170 = vmatmul.mubr.msk.bf16.vlgmr.msra.gmra.mrb[4].mxu1 %vm93_vm0, %v40_v7 }
  0x13   :  { %1181 = vmatprep.mubr.msk.bf16.mxu1 %vm1318_vm1, %v1317_v8 }
  0xdd   :  { %v131_v13 = vpop.f32.mrb[0].mxu1 }
  0xde   :  { %v133_v15 = vpop.f32.mrb[1].mxu1  ;;  %v132_v23 = vadd.f32 %v131_v13, %v52_v21  ;;  %v360_v21 = vsub.s32 3, %v1373_v10 }
  0xdf   :  { %v135_v17 = vpop.f32.mrb[2].mxu1  ;;  %v134_v19 = vadd.f32 %v133_v15, %v56_v14  ;;  %v1274_v15 = vld [vmem:[%s1624_s2 + $0x10] sm:$0xff]  }
  0xe0   :  { %v136_v18 = vpop.f32.mrb[3].mxu1  ;;  %v180_v24 = vpack.c.bf16 %v132_v23, %v132_v23  ;;  %v1278_v17 = vld [vmem:[%s1621_s1 + $0x34] ss:$12 sps:$4 sm:$0xff]   ;;  %v361_v23 = vrot.slane %v1385_v16, %v360_v21 }
  0xe1   :  { %v137_v20 = vadd.f32 %v136_v18, %v56_v14 }
  0xe3   :  { %v181_v22 = vpack.c.bf16 %v137_v20, %v134_v19 }
  0xe5   :  { %1174 = vmatpush3.bf16.xpose.msra.mxu0 %v181_v22  ;;  %v173_v37 = vpop.f32.mrb[4].mxu1  ;;  %v365_v22 = vsub.s32 4, %v1373_v10 }
  0xe6   :  { %1185 = vmatprep.subr.bf16.mxu0 %v1317_v8  ;;  %v174_v38 = vadd.f32 %v173_v37, %v60_v36  ;;  %v1171_v39 = vpop.f32.mrb[5].mxu1  ;;  %v1284_v37 = vld [vmem:[%s1624_s2 + $0x30] sm:$0xff]  }
  0xe7   :  { %v176_v40 = vpop.f32.mrb[6].mxu1  ;;  %v366_v26 = vrot.slane %v1385_v16, %v365_v22  ;;  %v371_v39 = vsub.s32 7, %v1373_v10 }
  0xe8   :  { %v177_v41 = vadd.f32 %v176_v40, %v60_v36  ;;  %v1172_v42 = vpop.f32.mrb[7].mxu1  ;;  %v1283_v36 = vld [vmem:[%s1624_s2 + $0x28] sm:$0xff]  }
  0xe9   :  { %v372_v40 = vrot.slane %v1385_v16, %v371_v39 }
  0xea   :  { %v237_v43 = vpack.c.bf16 %v177_v41, %v174_v38  ;;  %v1285_v38 = vld [vmem:[%s1624_s2 + $0x38] sm:$0xff]  }
  0xec   :  { %1176 = vmatmul.mubr.bf16.vlgmr.msra.gmra.mrb[0].mxu0 %v180_v24  ;;  %1180 = vmatpush3.bf16.msra.mxu1 %v237_v43 }
  0xed   :  { %1189 = vmatprep.mubr.msk.bf16.mxu0 %vm1318_vm1, %v1317_v8  ;;  %1193 = vmatprep.subr.bf16.mxu1 %v1317_v8 }
  0xee   :  { %1186 = vmatpush3.bf16.msra.mxu0 %v1272_v49 }
  0xef   :  { %1187 = vmatprep.subr.bf16.mxu0 %v1317_v8 }
  0xf2   :  { %1188 = vmatpush3.bf16.msra.mxu0 %v1273_v50 }
  0xf3   :  { %1201 = vmatprep.subr.bf16.mxu0 %v1317_v8 }
 0x1bf   :  { %v216_v27 = vpop.f32.mrb[0].mxu0 }
 0x1c0   :  { %v222_v29 = vmul.f32 0.17677669, %v216_v27  ;;  %v1177_v30 = vpop.f32.mrb[1].mxu0 }
 0x1c1   :  { %v219_v31 = vpop.f32.mrb[2].mxu0 }
 0x1c2   :  { %v1178_v32 = vpop.f32.mrb[3].mxu0  ;;  %v223_v33 = vadd.f32 %v222_v29, %v23_v28  ;;  %v1276_v29 = vld [vmem:[%s1621_s1 + $0x30] ss:$12 sps:$4 sm:$0xff]   ;;  %v1281_v31 = vld [vmem:[%s1621_s1 + $0x4c] ss:$12 sps:$4 sm:$0xff]  }
 0x1c3   :  { %v1279_v32 = vld [vmem:[%s1621_s1 + $0x48] ss:$12 sps:$4 sm:$0xff]  }
 0x1c4   :  { %v225_v34 = vsel %vm224_vm2, %v223_v33, -inf }
 0x1c5   :  { %226 = vmax.xlane.f32.xlu0 %v225_v34  ;;  %v1080_v34 = vld [vmem:[%s1622_s0 + $0x18] sm:$0xff] }
 0x252   :  { %v227_v44 = vpop.xlane.xlu0 %226 }
 0x253   :  { %v228_v45 = vsub.f32 %v223_v33, %v227_v44  ;;  %v1470_v33 = vld [vmem:[%s1622_s0 + $0x10] sm:$0xff] }
 0x254   :  { %v559_v35 = vpack.c.bf16 %v1080_v34, %v1470_v33 }
 0x255   :  { %v229_v46 = vmul.f32 1.442695, %v228_v45 }
 0x257   :  { %1296 = vpow2.f32 %v229_v46 }
 0x261   :  { %v1297_v47 = vpop.eup %1296 }
 0x262   :  { %v231_v48 = vsel %vm224_vm2, %v1297_v47, 0.0 }
 0x263   :  { %232 = vadd.xlane.f32.xlu0 %v231_v48 }
 0x2f0   :  { %v233_v51 = vpop.xlane.xlu0 %232 }
 0x2f1   :  { %1298 = vrcp.f32 %v233_v51 }
 0x2fb   :  { %v1299_v52 = vpop.eup %1298 }
 0x2fc   :  { %v235_v53 = vmul.f32 %v1299_v52, %v1297_v47  ;;  %v1082_v47 = vld [vmem:[%s1623_s3 + $0x38] sm:$0xff] }
 0x2fd   :  { %v576_v49 = vrot.slane %v1082_v47, %v1376_v11 }
 0x2fe   :  { %v236_v54 = vpack.c.bf16 %v235_v53, %v235_v53 }
 0x300   :  { %1182 = vmatmul.mubr.msk.bf16.vlgmr.msra.gmra.mrb[8].mxu1 %vm238_vm3, %v236_v54 }
 0x301   :  { %1197 = vmatprep.mubr.msk.bf16.mxu1 %vm1318_vm1, %v1317_v8  ;;  %1194 = vmatpush3.bf16.msra.mxu1 %v1274_v15 }
 0x302   :  { %1195 = vmatprep.subr.bf16.mxu1 %v1317_v8 }
 0x3d3   :  { %v276_v55 = vpop.f32.mrb[8].mxu1 }
 0x3d4   :  { %v282_v56 = vpack.c.bf16 %v276_v55, %v276_v55  ;;  %v1183_v57 = vpop.f32.mrb[9].mxu1 }
 0x3d5   :  { %v279_v58 = vpop.f32.mrb[10].mxu1 }
 0x3d6   :  { %v1184_v59 = vpop.f32.mrb[11].mxu1  ;;  %1190 = vmatmul.mubr.msk.bf16.vlgmr.msra.gmra.mrb[4].mxu0 %vm93_vm0, %v282_v56 }
 0x3d7   :  { %1209 = vmatprep.mubr.msk.bf16.mxu0 %vm1318_vm1, %v1317_v8 }
 0x4a9   :  { %v336_v62 = vpop.f32.mrb[4].mxu0 }
 0x4aa   :  { %v337_v63 = vadd.f32 %v336_v62, %v286_v61  ;;  %v1191_v0 = vpop.f32.mrb[5].mxu0 }
 0x4ab   :  { %v339_v2 = vpop.f32.mrb[6].mxu0  ;;  %v1507_v0 = vld [vmem:[%s1623_s3 + $0x30] sm:$0xff] }
 0x4ac   :  { %v1192_v3 = vpop.f32.mrb[7].mxu0  ;;  %v342_v4 = vadd.f32 %v337_v63, %v1360_v5  ;;  %v1275_v5 = vld [vmem:[%s1624_s2 + $0x18] sm:$0xff]  }
 0x4ad   :  { %1196 = vmatpush3.bf16.msra.mxu1 %v1275_v5 }
 0x4ae   :  { %v344_v6 = vsel %vm343_vm4, %v342_v4, 0.0  ;;  %616 = vmatprep.subr.bf16.mxu1 %v1278_v17 }
 0x4af   :  { %345 = vadd.xlane.f32.xlu1 %v344_v6 }
 0x53c   :  { %v346_v7 = vpop.xlane.xlu1 %345 }
 0x53d   :  { %v348_v9 = vmul.f32 0.03125, %v346_v7 }
 0x53f   :  { %v349_v12 = vsub.f32 %v342_v4, %v348_v9  ;;  %v572_v4 = vrot.slane %v1507_v0, %v1376_v11  ;;  %v1286_v9 = vld [vmem:[%s1621_s1 + $0x38] ss:$12 sps:$4 sm:$0xff]  }
 0x541   :  { %v350_v13 = vmul.f32 %v349_v12, %v349_v12 }
 0x543   :  { %v351_v14 = vsel %vm343_vm4, %v350_v13, 0.0 }
 0x544   :  { %352 = vadd.xlane.f32.xlu1 %v351_v14 }
 0x5d1   :  { %v353_v18 = vpop.xlane.xlu1 %352 }
 0x5d2   :  { %v354_v19 = vmul.f32 0.03125, %v353_v18  ;;  %v1084_v18 = vld [vmem:[%s1623_s3 + $0x48] sm:$0xff] }
 0x5d4   :  { %v355_v20 = vadd.f32 1e-12, %v354_v19 }
 0x5d6   :  { %1300 = vrsqrt.f32 %v355_v20 }
 0x5e0   :  { %v1301_v24 = vpop.eup %1300 }
 0x5e1   :  { %v357_v25 = vmul.f32 %v1301_v24, %v349_v12  ;;  %v1287_v12 = vld [vmem:[%s1621_s1 + $0x50] ss:$12 sps:$4 sm:$0xff]  }
 0x5e3   :  { %v362_v27 = vmul.f32 %v361_v23, %v357_v25 }
 0x5e5   :  { %v1452_v28 = vadd.f32 %v366_v26, %v362_v27  ;;  %v1083_v27 = vld [vmem:[%s1623_s3 + $0x40] sm:$0xff] }
 0x5e7   :  { %v368_v30 = vpack.c.bf16 %v1452_v28, %v1452_v28 }
 0x5e9   :  { %1198 = vmatmul.mubr.msk.bf16.vlgmr.msra.gmra.mrb[12].mxu1 %vm93_vm0, %v368_v30 }
 0x5ea   :  { %617 = vmatpush1.bf16.msra.mxu1 %v1276_v29  ;;  %648 = vmatprep.mubr.bf16.mxu1 %v1316_v1  ;;  %v1282_v1 = vld [vmem:[%s1624_s2 + $0x20] sm:$0xff]   ;;  %v580_v29 = vrot.slane %v1083_v27, %v1376_v11 }
 0x5eb   :  { %618 = vmatprep.subr.bf16.mxu1 %v1281_v31  ;;  %1202 = vmatpush3.bf16.msra.mxu0 %v1282_v1  ;;  %v1288_v11 = vld [vmem:[%s1624_s2 + $0x40] sm:$0xff]  }
 0x5ec   :  { %1203 = vmatprep.subr.bf16.mxu0 %v1317_v8 }
 0x5ee   :  { %619 = vmatpush1.bf16.msra.mxu1 %v1279_v32 }
 0x5ef   :  { %1213 = vmatprep.subr.bf16.mxu1 %v1317_v8  ;;  %1204 = vmatpush3.bf16.msra.mxu0 %v1283_v36 }
 0x5f0   :  { %1205 = vmatprep.subr.bf16.mxu0 %v1317_v8 }
 0x5f1   :  { %1115 = vmatmul.mubr.msk.bf16.vlgmr.msra.gmra.mrb[16].mxu1 %vm93_vm0, %v559_v35 }
 0x5f2   :  { %1217 = vmatprep.mubr.msk.bf16.mxu1 %vm1318_vm1, %v1317_v8  ;;  %1214 = vmatpush3.bf16.msra.mxu1 %v1286_v9 }
 0x5f3   :  { %1206 = vmatpush3.bf16.msra.mxu0 %v1284_v37  ;;  %1215 = vmatprep.subr.bf16.mxu1 %v1317_v8 }
 0x5f4   :  { %1207 = vmatprep.subr.bf16.mxu0 %v1317_v8 }
 0x5f6   :  { %1216 = vmatpush3.bf16.msra.mxu1 %v1287_v12  ;;  %v1290_v12 = vld [vmem:[%s1624_s2 + $0x50] sm:$0xff]  }
 0x5f7   :  { %1208 = vmatpush3.bf16.msra.mxu0 %v1285_v38  ;;  %1227 = vmatprep.subr.bf16.mxu1 %v1317_v8 }
 0x5f8   :  { %1221 = vmatprep.subr.bf16.mxu0 %v1317_v8 }
 0x5f9   :  { %1218 = vmatmul.mubr.msk.bf16.vlgmr.msra.gmra.mrb[20].mxu1 %vm93_vm0, %v559_v35 }
 0x5fa   :  { %1229 = vmatprep.mubr.msk.bf16.mxu1 %vm1318_vm1, %v1317_v8 }
 0x6bc   :  { %v422_v41 = vpop.f32.mrb[12].mxu1 }
 0x6bd   :  { %v423_v42 = vadd.f32 %v422_v41, %v372_v40  ;;  %v1199_v43 = vpop.f32.mrb[13].mxu1 }
 0x6be   :  { %v425_v44 = vpop.f32.mrb[14].mxu1  ;;  %v1289_v43 = vld [vmem:[%s1624_s2 + $0x48] sm:$0xff]  }
 0x6bf   :  { %v428_v45 = vmul.f32 %v423_v42, %v423_v42  ;;  %v1200_v46 = vpop.f32.mrb[15].mxu1 }
 0x6c1   :  { %v429_v48 = vmul.f32 %v428_v45, %v423_v42 }
 0x6c3   :  { %v430_v50 = vmul.f32 0.044715, %v429_v48 }
 0x6c4   :  { %v650_v51 = vpop.f32.mrb[16].mxu1 }
 0x6c5   :  { %v431_v52 = vadd.f32 %v430_v50, %v423_v42  ;;  %v652_v53 = vpop.f32.mrb[17].mxu1  ;;  %v651_v6 = vadd.f32 %v650_v51, %v572_v4 }
 0x6c6   :  { %v653_v54 = vadd.f32 %v652_v53, %v576_v49  ;;  %v654_v55 = vpop.f32.mrb[18].mxu1  ;;  %v803_v53 = vrot.slane %v1507_v0, %v285_v60 }
 0x6c7   :  { %v432_v56 = vmul.f32 0.7978846, %v431_v52  ;;  %v655_v57 = vpop.f32.mrb[19].mxu1  ;;  %v699_v7 = vpack.c.bf16 %v651_v6, %v651_v6 }
 0x6c8   :  { %v656_v58 = vadd.f32 %v655_v57, %v576_v49 }
 0x6c9   :  { %1302 = vtanh.f32 %v432_v56 }
 0x6ca   :  { %v700_v59 = vpack.c.bf16 %v656_v58, %v653_v54 }
 0x6cc   :  { %v692_v30 = vpop.f32.mrb[20].mxu1 }
 0x6cd   :  { %v693_v31 = vadd.f32 %v692_v30, %v580_v29  ;;  %v1219_v32 = vpop.f32.mrb[21].mxu1 }
 0x6ce   :  { %v695_v34 = vpop.f32.mrb[22].mxu1  ;;  %v1295_v32 = vld [vmem:[%s1624_s2 + $0x78] sm:$0xff]  }
 0x6cf   :  { %v696_v35 = vadd.f32 %v695_v34, %v580_v29  ;;  %v1220_v1 = vpop.f32.mrb[23].mxu1  ;;  %v887_v34 = vrot.slane %v1507_v0, %v371_v39 }
 0x6d1   :  { %v755_v36 = vpack.c.bf16 %v696_v35, %v693_v31  ;;  %v1292_v31 = vld [vmem:[%s1624_s2 + $0x60] sm:$0xff]  }
 0x6d3   :  { %v1303_v61 = vpop.eup %1302  ;;  %1228 = vmatpush3.bf16.msra.mxu1 %v755_v36 }
 0x6d4   :  { %v434_v62 = vadd.f32 1.0, %v1303_v61  ;;  %1241 = vmatprep.subr.bf16.mxu1 %v1317_v8 }
 0x6d6   :  { %v435_v63 = vmul.f32 0.5, %v434_v62  ;;  %v440_v62 = vsub.s32 2, %v1373_v10 }
 0x6d8   :  { %v436_v2 = vmul.f32 %v435_v63, %v423_v42  ;;  %v441_v63 = vrot.slane %v1385_v16, %v440_v62  ;;  %v956_v39 = vrot.slane %v1507_v0, %v440_v62 }
 0x6da   :  { %v437_v3 = vpack.c.bf16 %v436_v2, %v436_v2 }
 0x6dc   :  { %1210 = vmatmul.mubr.msk.bf16.vlgmr.msra.gmra.mrb[8].mxu0 %vm466_vm5, %v437_v3 }
 0x6dd   :  { %1222 = vmatpush3.bf16.xpose.msra.mxu0 %v700_v59  ;;  %1223 = vmatprep.mubr.msk.bf16.mxu0 %vm1318_vm1, %v1317_v8 }
 0x6de   :  { %1233 = vmatprep.subr.bf16.mxu0 %v1317_v8 }
 0x6e4   :  { %1224 = vmatmul.mubr.bf16.vlgmr.msra.gmra.mrb[12].mxu0 %v699_v7 }
 0x6e5   :  { %1237 = vmatprep.mubr.msk.bf16.mxu0 %vm1318_vm1, %v1317_v8  ;;  %1234 = vmatpush3.bf16.msra.mxu0 %v1288_v11 }
 0x6e6   :  { %1235 = vmatprep.subr.bf16.mxu0 %v1317_v8 }
 0x6e9   :  { %1236 = vmatpush3.bf16.msra.mxu0 %v1289_v43 }
 0x6ea   :  { %1249 = vmatprep.subr.bf16.mxu0 %v1317_v8 }
 0x7af   :  { %v1528_v13 = vpop.f32.mrb[8].mxu0 }
 0x7b0   :  { %v1211_v14 = vpop.f32.mrb[9].mxu0  ;;  %v505_v60 = vadd.f32 %v1528_v13, %v441_v63 }
 0x7b1   :  { %v507_v15 = vpop.f32.mrb[10].mxu0  ;;  %v1291_v14 = vld [vmem:[%s1624_s2 + $0x58] sm:$0xff]  }
 0x7b2   :  { %v1212_v5 = vpop.f32.mrb[11].mxu0  ;;  %v510_v9 = vadd.f32 %v505_v60, %v1452_v28 }
 0x7b7   :  { %v735_v17 = vpop.f32.mrb[12].mxu0 }
 0x7b8   :  { %v741_v19 = vmul.f32 0.17677669, %v735_v17  ;;  %v1225_v20 = vpop.f32.mrb[13].mxu0 }
 0x7b9   :  { %v738_v23 = vpop.f32.mrb[14].mxu0 }
 0x7ba   :  { %v1226_v24 = vpop.f32.mrb[15].mxu0  ;;  %v742_v25 = vadd.f32 %v1084_v18, %v741_v19  ;;  %v876_v23 = vrot.slane %v1507_v0, %v360_v21  ;;  %v1293_v21 = vld [vmem:[%s1624_s2 + $0x68] sm:$0xff]  }
 0x7bc   :  { %v743_v26 = vsel %vm224_vm2, %v742_v25, -inf }
 0x7bd   :  { %744 = vmax.xlane.f32.xlu0 %v743_v26  ;;  %v881_v26 = vrot.slane %v1507_v0, %v365_v22  ;;  %v1294_v22 = vld [vmem:[%s1624_s2 + $0x70] sm:$0xff]  }
 0x84a   :  { %v745_v37 = vpop.xlane.xlu0 %744 }
 0x84b   :  { %v746_v38 = vsub.f32 %v742_v25, %v745_v37 }
 0x84d   :  { %v747_v40 = vmul.f32 1.442695, %v746_v38 }
 0x84f   :  { %1304 = vpow2.f32 %v747_v40 }
 0x859   :  { %v1305_v41 = vpop.eup %1304 }
 0x85a   :  { %v749_v42 = vsel %vm224_vm2, %v1305_v41, 0.0 }
 0x85b   :  { %750 = vadd.xlane.f32.xlu1 %v749_v42 }
 0x8e8   :  { %v751_v44 = vpop.xlane.xlu1 %750 }
 0x8e9   :  { %1306 = vrcp.f32 %v751_v44 }
 0x8f3   :  { %v1307_v45 = vpop.eup %1306 }
 0x8f4   :  { %v753_v46 = vmul.f32 %v1307_v45, %v1305_v41 }
 0x8f6   :  { %v754_v47 = vpack.c.bf16 %v753_v46, %v753_v46 }
 0x8f8   :  { %1230 = vmatmul.mubr.msk.bf16.vlgmr.msra.gmra.mrb[24].mxu1 %vm238_vm3, %v754_v47 }
 0x8f9   :  { %1245 = vmatprep.mubr.msk.bf16.mxu1 %vm1318_vm1, %v1317_v8  ;;  %1242 = vmatpush3.bf16.msra.mxu1 %v1290_v12 }
 0x8fa   :  { %1243 = vmatprep.subr.bf16.mxu1 %v1317_v8 }
 0x8fd   :  { %1244 = vmatpush3.bf16.msra.mxu1 %v1291_v14 }
 0x9cb   :  { %v793_v48 = vpop.f32.mrb[24].mxu1 }
 0x9cc   :  { %v799_v49 = vpack.c.bf16 %v793_v48, %v793_v48  ;;  %v1231_v50 = vpop.f32.mrb[25].mxu1 }
 0x9cd   :  { %v796_v51 = vpop.f32.mrb[26].mxu1 }
 0x9ce   :  { %v1232_v52 = vpop.f32.mrb[27].mxu1  ;;  %1238 = vmatmul.mubr.msk.bf16.vlgmr.msra.gmra.mrb[16].mxu0 %vm93_vm0, %v799_v49 }
 0x9cf   :  { %1257 = vmatprep.mubr.msk.bf16.mxu0 %vm1318_vm1, %v1317_v8  ;;  %1250 = vmatpush3.bf16.msra.mxu0 %v1292_v31 }
 0x9d0   :  { %1251 = vmatprep.subr.bf16.mxu0 %v1317_v8 }
 0x9d3   :  { %1252 = vmatpush3.bf16.msra.mxu0 %v1293_v21 }
 0x9d4   :  { %1253 = vmatprep.subr.bf16.mxu0 %v1317_v8 }
 0x9d7   :  { %1254 = vmatpush3.bf16.msra.mxu0 %v1294_v22 }
 0x9d8   :  { %1255 = vmatprep.subr.bf16.mxu0 %v1317_v8 }
 0x9db   :  { %1256 = vmatpush3.bf16.msra.mxu0 %v1295_v32 }
 0xaa1   :  { %v853_v54 = vpop.f32.mrb[16].mxu0 }
 0xaa2   :  { %v854_v55 = vadd.f32 %v853_v54, %v803_v53  ;;  %v1239_v56 = vpop.f32.mrb[17].mxu0 }
 0xaa3   :  { %v856_v57 = vpop.f32.mrb[18].mxu0 }
 0xaa4   :  { %v1240_v58 = vpop.f32.mrb[19].mxu0  ;;  %v859_v59 = vadd.f32 %v1470_v33, %v854_v55  ;;  %v511_v33 = vsel %vm343_vm4, %v510_v9, 0.0 }
 0xaa6   :  { %v860_v61 = vsel %vm343_vm4, %v859_v59, 0.0 }
 0xaa7   :  { %861 = vadd.xlane.f32.xlu0 %v860_v61 }
 0xb34   :  { %v862_v2 = vpop.xlane.xlu0 %861 }
 0xb35   :  { %v863_v3 = vmul.f32 0.03125, %v862_v2 }
 0xb37   :  { %v864_v4 = vsub.f32 %v859_v59, %v863_v3 }
 0xb39   :  { %v865_v6 = vmul.f32 %v864_v4, %v864_v4 }
 0xb3b   :  { %v866_v7 = vsel %vm343_vm4, %v865_v6, 0.0 }
 0xb3c   :  { %867 = vadd.xlane.f32.xlu1 %v866_v7 }
 0xb40   :  { %512 = vadd.xlane.f32.xlu1 %v511_v33 }
 0xbc9   :  { %v868_v13 = vpop.xlane.xlu1 %867 }
 0xbca   :  { %v869_v15 = vmul.f32 0.03125, %v868_v13 }
 0xbcc   :  { %v870_v5 = vadd.f32 1e-12, %v869_v15 }
 0xbcd   :  { %v513_v28 = vpop.xlane.xlu1 %512 }
 0xbce   :  { %1308 = vrsqrt.f32 %v870_v5  ;;  %v514_v17 = vmul.f32 0.03125, %v513_v28 }
 0xbd0   :  { %v1574_v18 = vsub.f32 %v510_v9, %v514_v17  ;;  %v531_v9 = vsub.s32 6, %v1373_v10 }
 0xbd2   :  { %v516_v19 = vmul.f32 %v1574_v18, %v1574_v18  ;;  %v1046_v13 = vrot.slane %v1507_v0, %v531_v9  ;;  %v532_v5 = vrot.slane %v1385_v16, %v531_v9 }
 0xbd4   :  { %v517_v20 = vsel %vm343_vm4, %v516_v19, 0.0 }
 0xbd5   :  { %518 = vadd.xlane.f32.xlu1 %v517_v20 }
 0xbd8   :  { %v1309_v24 = vpop.eup %1308 }
 0xbd9   :  { %v872_v25 = vmul.f32 %v1309_v24, %v864_v4  ;;  %v526_v4 = vsub.s32 5, %v1373_v10 }
 0xbdb   :  { %v877_v27 = vmul.f32 %v876_v23, %v872_v25  ;;  %v527_v7 = vrot.slane %v1385_v16, %v526_v4  ;;  %v1041_v12 = vrot.slane %v1507_v0, %v526_v4 }
 0xbdd   :  { %v882_v29 = vadd.f32 %v881_v26, %v877_v27 }
 0xbdf   :  { %v883_v30 = vpack.c.bf16 %v882_v29, %v882_v29 }
 0xbe1   :  { %1246 = vmatmul.mubr.msk.bf16.vlgmr.msra.gmra.mrb[28].mxu1 %vm93_vm0, %v883_v30 }
 0xc62   :  { %v519_v61 = vpop.xlane.xlu1 %518 }
 0xc63   :  { %v520_v63 = vmul.f32 0.03125, %v519_v61 }
 0xc65   :  { %v521_v2 = vadd.f32 1e-12, %v520_v63 }
 0xcb4   :  { %v937_v35 = vpop.f32.mrb[28].mxu1 }
 0xcb5   :  { %v938_v1 = vadd.f32 %v937_v35, %v887_v34  ;;  %v1247_v36 = vpop.f32.mrb[29].mxu1 }
 0xcb6   :  { %v940_v37 = vpop.f32.mrb[30].mxu1 }
 0xcb7   :  { %v943_v38 = vmul.f32 %v938_v1, %v938_v1  ;;  %v1248_v40 = vpop.f32.mrb[31].mxu1 }
 0xcb9   :  { %v944_v41 = vmul.f32 %v943_v38, %v938_v1 }
 0xcbb   :  { %v945_v42 = vmul.f32 0.044715, %v944_v41 }
 0xcbd   :  { %v946_v11 = vadd.f32 %v945_v42, %v938_v1 }
 0xcbf   :  { %v947_v43 = vmul.f32 0.7978846, %v946_v11 }
 0xcc1   :  { %1310 = vtanh.f32 %v947_v43 }
 0xcc2   :  { %1312 = vrsqrt.f32 %v521_v2 }
 0xccb   :  { %v1311_v8 = vpop.eup %1310 }
 0xccc   :  { %v949_v44 = vadd.f32 1.0, %v1311_v8  ;;  %v1313_v6 = vpop.eup %1312 }
 0xccd   :  { %v523_v33 = vmul.f32 %v1313_v6, %v1574_v18 }
 0xcce   :  { %v950_v45 = vmul.f32 0.5, %v949_v44 }
 0xccf   :  { %v528_v28 = vmul.f32 %v527_v7, %v523_v33 }
 0xcd0   :  { %v951_v46 = vmul.f32 %v950_v45, %v938_v1 }
 0xcd1   :  { %v533_v20 = vadd.f32 %v532_v5, %v528_v28 }
 0xcd2   :  { %v952_v47 = vpack.c.bf16 %v951_v46, %v951_v46 }
 0xcd4   :  { %1258 = vmatmul.mubr.msk.bf16.vlgmr.msra.gmra.mrb[20].mxu0 %vm466_vm5, %v952_v47 }
 0xda7   :  { %v1018_v48 = vpop.f32.mrb[20].mxu0 }
 0xda8   :  { %v1019_v49 = vadd.f32 %v1018_v48, %v956_v39  ;;  %v1259_v50 = vpop.f32.mrb[21].mxu0 }
 0xda9   :  { %v1021_v51 = vpop.f32.mrb[22].mxu0 }
 0xdaa   :  { %v1260_v52 = vpop.f32.mrb[23].mxu0  ;;  %v1024_v53 = vadd.f32 %v1019_v49, %v882_v29 }
 0xdac   :  { %v1025_v54 = vsel %vm343_vm4, %v1024_v53, 0.0 }
 0xdad   :  { %1026 = vadd.xlane.f32.xlu0 %v1025_v54 }
 0xe3a   :  { %v1027_v55 = vpop.xlane.xlu0 %1026 }
 0xe3b   :  { %v1028_v56 = vmul.f32 0.03125, %v1027_v55 }
 0xe3d   :  { %v1029_v57 = vsub.f32 %v1024_v53, %v1028_v56 }
 0xe3f   :  { %v1030_v58 = vmul.f32 %v1029_v57, %v1029_v57 }
 0xe41   :  { %v1031_v59 = vsel %vm343_vm4, %v1030_v58, 0.0 }
 0xe42   :  { %1032 = vadd.xlane.f32.xlu0 %v1031_v59 }
 0xecf   :  { %v1033_v62 = vpop.xlane.xlu0 %1032 }
 0xed0   :  { %v1034_v3 = vmul.f32 0.03125, %v1033_v62 }
 0xed2   :  { %v1035_v60 = vadd.f32 1e-12, %v1034_v3 }
 0xed4   :  { %1314 = vrsqrt.f32 %v1035_v60 }
 0xede   :  { %v1315_v14 = vpop.eup %1314 }
 0xedf   :  { %v1037_v15 = vmul.f32 %v1315_v14, %v1029_v57 }
 0xee1   :  { %v1042_v17 = vmul.f32 %v1041_v12, %v1037_v15 }
 0xee3   :  { %v1047_v19 = vadd.f32 %v1046_v13, %v1042_v17 }
 0xee5   :  { %v1049_v23 = vrot.slane %v1047_v19, 6 }
 0xee7   :  { %v1052_v24 = vsel %vm1051_vm6, %v533_v20, %v1049_v23 }
 0xee8   :  { %v1053_v25 = vsel %vm93_vm0, %v1052_v24, 0.0 }
 0xee9   :  { %1054 = vst [vmem:[%s1625_s4] sm:$0xf] %v1053_v25 }

</bundles_post_ra>
